<compile_context>
chip_gen: v5e
topology: v5e:2x2
jax: 0.10.0
libtpu: 0.0.40
codegen_flags: <defaults>
</compile_context>

<pallas_src>
import jax
import jax.numpy as jnp
from jax.experimental import pallas as pl
from jax.experimental.pallas import tpu as pltpu

_DIMS = [128, 128, 128, 64, 32, 32, 64, 128]  # layer i: in=_DIMS[i], out=_DIMS[i+1]
_EPS = 1e-5


# ---------------- Pallas kernel ----------------

def _autoencoder_kernel(x_ref, sin_ref, tin_ref, *rest):
    """rest = 7 x (Wf, bf) folded linears, (s4, t4, s6, t6), then (low_ref, loss_ref)."""
    low_ref, loss_ref = rest[-2], rest[-1]
    prm = rest[:-2]
    wb = prm[:14]
    s4_ref, t4_ref, s6_ref, t6_ref = prm[14:18]

    # Input norm_layer is folded into fc0's weights, so layer 0 consumes raw x directly.
    h = x_ref[...]

    # 7 x (Linear[+folded BN of previous stage], Dropout(eval)=identity, ReLU)
    for i in range(7):
        w_ref, b_ref = wb[2 * i], wb[2 * i + 1]
        h = jnp.dot(h, w_ref[...], preferred_element_type=jnp.float32) + b_ref[...]
        h = jnp.maximum(h, 0.0)
        if i == 4:  # encoder output boundary (bn4): apply its affine -> low_embed
            low_ref[...] = h * s4_ref[...] + t4_ref[...]

    # decoder output boundary (bn6) affine -> reconstruction
    rec = h * s6_ref[...] + t6_ref[...]

    # Recompute normed_x here (x tile is VMEM-resident) instead of keeping it live across
    # the 7-layer unroll -> frees vregs for the matmul chain.
    xn = x_ref[...] * sin_ref[...] + tin_ref[...]
    diff = xn - rec
    loss_ref[...] = jnp.sum(diff * diff, axis=1, keepdims=True)


# ---------------- parameter construction ----------------

def init_params(key):
    """PyTorch-style Linear init + randomized (but fixed) BN eval statistics.

    Returns (sin, tin, raw) where raw is a flat list of 28 arrays:
    7 x (W[in,out], b[1,out], bn_scale[1,out], bn_shift[1,out]).
    """
    def bn_affine(k, f):
        kg, kb, km, kv = jax.random.split(k, 4)
        gamma = jax.random.uniform(kg, (1, f), jnp.float32, 0.5, 1.5)
        beta = 0.1 * jax.random.normal(kb, (1, f), jnp.float32)
        mean = 0.1 * jax.random.normal(km, (1, f), jnp.float32)
        var = jax.random.uniform(kv, (1, f), jnp.float32, 0.5, 1.5)
        s = gamma / jnp.sqrt(var + _EPS)
        t = beta - mean * s
        return s, t

    key, kin = jax.random.split(key)
    sin, tin = bn_affine(kin, 128)  # input norm_layer

    raw = []
    for i in range(7):
        fan_in, fan_out = _DIMS[i], _DIMS[i + 1]
        key, kw, kb, kn = jax.random.split(key, 4)
        bound = 1.0 / jnp.sqrt(float(fan_in))
        w = jax.random.uniform(kw, (fan_in, fan_out), jnp.float32, -bound, bound)
        b = jax.random.uniform(kb, (1, fan_out), jnp.float32, -bound, bound)
        s, t = bn_affine(kn, fan_out)
        raw += [w, b, s, t]
    return sin, tin, raw


def fold_params(sin, tin, raw):
    """Fold each layer's *preceding* BN affine (incl. the input norm_layer) into its Linear.

    Exact in f32:  (r*s + t) @ W + b == r @ (diag(s) W) + (t @ W + b).
    Returns [Wf0, bf0, ..., Wf6, bf6, s4, t4, s6, t6] (18 arrays) for the kernel.
    """
    folded = []
    prev_s, prev_t = sin, tin  # input norm_layer folds into fc0
    for i in range(7):
        w, b, s, t = raw[4 * i: 4 * i + 4]
        wf = prev_s.reshape(-1, 1) * w          # diag(s_prev) @ W
        bf = b + prev_t @ w                     # t_prev @ W + b
        folded += [wf, bf]
        prev_s, prev_t = s, t
    s4, t4 = raw[4 * 4 + 2], raw[4 * 4 + 3]     # bn4 affine (low_embed boundary)
    s6, t6 = raw[4 * 6 + 2], raw[4 * 6 + 3]     # bn6 affine (reconstruction)
    folded += [s4, t4, s6, t6]
    return folded


# ---------------- wrapper ----------------

def _round_up(n, m):
    return pl.cdiv(n, m) * m


def autoencoder_forward(x, sin, tin, folded, *, tm=512):
    N, F = x.shape
    TM = min(tm, _round_up(max(N, 1), 8))       # sublane-aligned batch tile
    Np = _round_up(N, TM)
    if Np != N:
        x = jnp.pad(x, ((0, Np - N), (0, 0)))   # pad -> no partial blocks
    grid = (Np // TM,)

    def batch_spec(cols):
        return pl.BlockSpec((TM, cols), lambda i: (i, 0))

    def const_spec(p):
        # full-size block, constant index -> stays VMEM-resident across the grid
        return pl.BlockSpec(p.shape, lambda i: (0, 0))

    in_specs = ([batch_spec(F), const_spec(sin), const_spec(tin)]
                + [const_spec(p) for p in folded])
    out_specs = (batch_spec(32), batch_spec(1))

    low, loss = pl.pallas_call(
        _autoencoder_kernel,
        out_shape=(
            jax.ShapeDtypeStruct((Np, 32), jnp.float32),  # low_embed
            jax.ShapeDtypeStruct((Np, 1), jnp.float32),   # reconstructed_loss (keepdims)
        ),
        grid=grid,
        in_specs=in_specs,
        out_specs=out_specs,
        compiler_params=pltpu.CompilerParams(
            dimension_semantics=("parallel",)),
    )(x, sin, tin, *folded)
    return low[:N], loss[:N, 0]


# ---------------- pure-JAX reference (unfolded params) ----------------

def _ref_forward(x, sin, tin, raw):
    xn = x * sin + tin
    h = xn
    low = None
    for i in range(7):
        w, b, s, t = raw[4 * i: 4 * i + 4]
        h = jnp.maximum(h @ w + b, 0.0) * s + t
        if i == 4:
            low = h
    return low, jnp.sum((xn - h) ** 2, axis=1)


if __name__ == "__main__":
    key = jax.random.PRNGKey(0)
    key, kx = jax.random.split(key)
    N = 8
    x = jax.random.normal(kx, (N, 128), dtype=jnp.float32)

    sin, tin, raw = init_params(key)
    folded = fold_params(sin, tin, raw)

    low, loss = autoencoder_forward(x, sin, tin, folded)
    jax.block_until_ready((low, loss))

    low_ref, loss_ref = _ref_forward(x, sin, tin, raw)
    assert low.shape == (N, 32) and loss.shape == (N,)
    assert jnp.allclose(low, low_ref, atol=1e-4, rtol=1e-4)
    assert jnp.allclose(loss, loss_ref, atol=1e-3, rtol=1e-4)

    print("KERNEL_OK")
</pallas_src>

<mosaic_0001>
module attributes {stable_mosaic.version = 11 : i64} {
  func.func @_autoencoder_kernel(%arg0: i32, %arg1: memref<8x128xf32, #tpu.memory_space<vmem>>, %arg2: memref<1x128xf32, #tpu.memory_space<vmem>>, %arg3: memref<1x128xf32, #tpu.memory_space<vmem>>, %arg4: memref<128x128xf32, #tpu.memory_space<vmem>>, %arg5: memref<1x128xf32, #tpu.memory_space<vmem>>, %arg6: memref<128x128xf32, #tpu.memory_space<vmem>>, %arg7: memref<1x128xf32, #tpu.memory_space<vmem>>, %arg8: memref<128x64xf32, #tpu.memory_space<vmem>>, %arg9: memref<1x64xf32, #tpu.memory_space<vmem>>, %arg10: memref<64x32xf32, #tpu.memory_space<vmem>>, %arg11: memref<1x32xf32, #tpu.memory_space<vmem>>, %arg12: memref<32x32xf32, #tpu.memory_space<vmem>>, %arg13: memref<1x32xf32, #tpu.memory_space<vmem>>, %arg14: memref<32x64xf32, #tpu.memory_space<vmem>>, %arg15: memref<1x64xf32, #tpu.memory_space<vmem>>, %arg16: memref<64x128xf32, #tpu.memory_space<vmem>>, %arg17: memref<1x128xf32, #tpu.memory_space<vmem>>, %arg18: memref<1x32xf32, #tpu.memory_space<vmem>>, %arg19: memref<1x32xf32, #tpu.memory_space<vmem>>, %arg20: memref<1x128xf32, #tpu.memory_space<vmem>>, %arg21: memref<1x128xf32, #tpu.memory_space<vmem>>, %arg22: memref<8x32xf32, #tpu.memory_space<vmem>>, %arg23: memref<8x1xf32, #tpu.memory_space<vmem>>) attributes {dimension_semantics = [#tpu.dimension_semantics<parallel>], iteration_bounds = array<i64: 1>, scalar_prefetch = 0 : i64, scratch_operands = 0 : i64, tpu.core_type = #tpu.core_type<tc>, window_params = [{transform_indices = @transform_0, window_bounds = array<i64: 8, 128>}, {pipeline_mode = #tpu.pipeline_mode<synchronous>, transform_indices = @transform_1, window_bounds = array<i64: 1, 128>}, {pipeline_mode = #tpu.pipeline_mode<synchronous>, transform_indices = @transform_2, window_bounds = array<i64: 1, 128>}, {pipeline_mode = #tpu.pipeline_mode<synchronous>, transform_indices = @transform_3, window_bounds = array<i64: 128, 128>}, {pipeline_mode = #tpu.pipeline_mode<synchronous>, transform_indices = @transform_4, window_bounds = array<i64: 1, 128>}, {pipeline_mode = #tpu.pipeline_mode<synchronous>, transform_indices = @transform_5, window_bounds = array<i64: 128, 128>}, {pipeline_mode = #tpu.pipeline_mode<synchronous>, transform_indices = @transform_6, window_bounds = array<i64: 1, 128>}, {pipeline_mode = #tpu.pipeline_mode<synchronous>, transform_indices = @transform_7, window_bounds = array<i64: 128, 64>}, {pipeline_mode = #tpu.pipeline_mode<synchronous>, transform_indices = @transform_8, window_bounds = array<i64: 1, 64>}, {pipeline_mode = #tpu.pipeline_mode<synchronous>, transform_indices = @transform_9, window_bounds = array<i64: 64, 32>}, {pipeline_mode = #tpu.pipeline_mode<synchronous>, transform_indices = @transform_10, window_bounds = array<i64: 1, 32>}, {pipeline_mode = #tpu.pipeline_mode<synchronous>, transform_indices = @transform_11, window_bounds = array<i64: 32, 32>}, {pipeline_mode = #tpu.pipeline_mode<synchronous>, transform_indices = @transform_12, window_bounds = array<i64: 1, 32>}, {pipeline_mode = #tpu.pipeline_mode<synchronous>, transform_indices = @transform_13, window_bounds = array<i64: 32, 64>}, {pipeline_mode = #tpu.pipeline_mode<synchronous>, transform_indices = @transform_14, window_bounds = array<i64: 1, 64>}, {pipeline_mode = #tpu.pipeline_mode<synchronous>, transform_indices = @transform_15, window_bounds = array<i64: 64, 128>}, {pipeline_mode = #tpu.pipeline_mode<synchronous>, transform_indices = @transform_16, window_bounds = array<i64: 1, 128>}, {pipeline_mode = #tpu.pipeline_mode<synchronous>, transform_indices = @transform_17, window_bounds = array<i64: 1, 32>}, {pipeline_mode = #tpu.pipeline_mode<synchronous>, transform_indices = @transform_18, window_bounds = array<i64: 1, 32>}, {pipeline_mode = #tpu.pipeline_mode<synchronous>, transform_indices = @transform_19, window_bounds = array<i64: 1, 128>}, {pipeline_mode = #tpu.pipeline_mode<synchronous>, transform_indices = @transform_20, window_bounds = array<i64: 1, 128>}, {transform_indices = @transform_21, window_bounds = array<i64: 8, 32>}, {transform_indices = @transform_22, window_bounds = array<i64: 8, 1>}]} {
    %c0 = arith.constant 0 : index
    %c0_0 = arith.constant 0 : index
    %0 = vector.load %arg1[%c0, %c0_0] : memref<8x128xf32, #tpu.memory_space<vmem>>, vector<8x128xf32>
    %c0_1 = arith.constant 0 : index
    %c0_2 = arith.constant 0 : index
    %1 = vector.load %arg4[%c0_1, %c0_2] : memref<128x128xf32, #tpu.memory_space<vmem>>, vector<128x128xf32>
    %cst = arith.constant dense<0.000000e+00> : vector<8x128xf32>
    %2 = tpu.matmul %0, %1, %cst {dimension_numbers = #tpu.dot_dimension_numbers<[1], [0], [0], [1], [0, 0, 1, 1], [], []>} : vector<8x128xf32>, vector<128x128xf32>, vector<8x128xf32> -> vector<8x128xf32>
    %c0_3 = arith.constant 0 : index
    %c0_4 = arith.constant 0 : index
    %3 = vector.load %arg5[%c0_3, %c0_4] : memref<1x128xf32, #tpu.memory_space<vmem>>, vector<1x128xf32>
    %4 = vector.broadcast %3 : vector<1x128xf32> to vector<8x128xf32>
    %5 = arith.addf %2, %4 : vector<8x128xf32>
    %cst_5 = arith.constant 0.000000e+00 : f32
    %6 = vector.broadcast %cst_5 : f32 to vector<8x128xf32>
    %7 = arith.maximumf %5, %6 : vector<8x128xf32>
    %c0_6 = arith.constant 0 : index
    %c0_7 = arith.constant 0 : index
    %8 = vector.load %arg6[%c0_6, %c0_7] : memref<128x128xf32, #tpu.memory_space<vmem>>, vector<128x128xf32>
    %cst_8 = arith.constant dense<0.000000e+00> : vector<8x128xf32>
    %9 = tpu.matmul %7, %8, %cst_8 {dimension_numbers = #tpu.dot_dimension_numbers<[1], [0], [0], [1], [0, 0, 1, 1], [], []>} : vector<8x128xf32>, vector<128x128xf32>, vector<8x128xf32> -> vector<8x128xf32>
    %c0_9 = arith.constant 0 : index
    %c0_10 = arith.constant 0 : index
    %10 = vector.load %arg7[%c0_9, %c0_10] : memref<1x128xf32, #tpu.memory_space<vmem>>, vector<1x128xf32>
    %11 = vector.broadcast %10 : vector<1x128xf32> to vector<8x128xf32>
    %12 = arith.addf %9, %11 : vector<8x128xf32>
    %cst_11 = arith.constant 0.000000e+00 : f32
    %13 = vector.broadcast %cst_11 : f32 to vector<8x128xf32>
    %14 = arith.maximumf %12, %13 : vector<8x128xf32>
    %c0_12 = arith.constant 0 : index
    %c0_13 = arith.constant 0 : index
    %15 = vector.load %arg8[%c0_12, %c0_13] : memref<128x64xf32, #tpu.memory_space<vmem>>, vector<128x64xf32>
    %cst_14 = arith.constant dense<0.000000e+00> : vector<8x64xf32>
    %16 = tpu.matmul %14, %15, %cst_14 {dimension_numbers = #tpu.dot_dimension_numbers<[1], [0], [0], [1], [0, 0, 1, 1], [], []>} : vector<8x128xf32>, vector<128x64xf32>, vector<8x64xf32> -> vector<8x64xf32>
    %c0_15 = arith.constant 0 : index
    %c0_16 = arith.constant 0 : index
    %17 = vector.load %arg9[%c0_15, %c0_16] : memref<1x64xf32, #tpu.memory_space<vmem>>, vector<1x64xf32>
    %18 = vector.broadcast %17 : vector<1x64xf32> to vector<8x64xf32>
    %19 = arith.addf %16, %18 : vector<8x64xf32>
    %cst_17 = arith.constant 0.000000e+00 : f32
    %20 = vector.broadcast %cst_17 : f32 to vector<8x64xf32>
    %21 = arith.maximumf %19, %20 : vector<8x64xf32>
    %c0_18 = arith.constant 0 : index
    %c0_19 = arith.constant 0 : index
    %22 = vector.load %arg10[%c0_18, %c0_19] : memref<64x32xf32, #tpu.memory_space<vmem>>, vector<64x32xf32>
    %cst_20 = arith.constant dense<0.000000e+00> : vector<8x32xf32>
    %23 = tpu.matmul %21, %22, %cst_20 {dimension_numbers = #tpu.dot_dimension_numbers<[1], [0], [0], [1], [0, 0, 1, 1], [], []>} : vector<8x64xf32>, vector<64x32xf32>, vector<8x32xf32> -> vector<8x32xf32>
    %c0_21 = arith.constant 0 : index
    %c0_22 = arith.constant 0 : index
    %24 = vector.load %arg11[%c0_21, %c0_22] : memref<1x32xf32, #tpu.memory_space<vmem>>, vector<1x32xf32>
    %25 = vector.broadcast %24 : vector<1x32xf32> to vector<8x32xf32>
    %26 = arith.addf %23, %25 : vector<8x32xf32>
    %cst_23 = arith.constant 0.000000e+00 : f32
    %27 = vector.broadcast %cst_23 : f32 to vector<8x32xf32>
    %28 = arith.maximumf %26, %27 : vector<8x32xf32>
    %c0_24 = arith.constant 0 : index
    %c0_25 = arith.constant 0 : index
    %29 = vector.load %arg12[%c0_24, %c0_25] : memref<32x32xf32, #tpu.memory_space<vmem>>, vector<32x32xf32>
    %cst_26 = arith.constant dense<0.000000e+00> : vector<8x32xf32>
    %30 = tpu.matmul %28, %29, %cst_26 {dimension_numbers = #tpu.dot_dimension_numbers<[1], [0], [0], [1], [0, 0, 1, 1], [], []>} : vector<8x32xf32>, vector<32x32xf32>, vector<8x32xf32> -> vector<8x32xf32>
    %c0_27 = arith.constant 0 : index
    %c0_28 = arith.constant 0 : index
    %31 = vector.load %arg13[%c0_27, %c0_28] : memref<1x32xf32, #tpu.memory_space<vmem>>, vector<1x32xf32>
    %32 = vector.broadcast %31 : vector<1x32xf32> to vector<8x32xf32>
    %33 = arith.addf %30, %32 : vector<8x32xf32>
    %cst_29 = arith.constant 0.000000e+00 : f32
    %34 = vector.broadcast %cst_29 : f32 to vector<8x32xf32>
    %35 = arith.maximumf %33, %34 : vector<8x32xf32>
    %c0_30 = arith.constant 0 : index
    %c0_31 = arith.constant 0 : index
    %36 = vector.load %arg18[%c0_30, %c0_31] : memref<1x32xf32, #tpu.memory_space<vmem>>, vector<1x32xf32>
    %37 = vector.broadcast %36 : vector<1x32xf32> to vector<8x32xf32>
    %38 = arith.mulf %35, %37 : vector<8x32xf32>
    %c0_32 = arith.constant 0 : index
    %c0_33 = arith.constant 0 : index
    %39 = vector.load %arg19[%c0_32, %c0_33] : memref<1x32xf32, #tpu.memory_space<vmem>>, vector<1x32xf32>
    %40 = vector.broadcast %39 : vector<1x32xf32> to vector<8x32xf32>
    %41 = arith.addf %38, %40 : vector<8x32xf32>
    %c0_34 = arith.constant 0 : index
    %c0_35 = arith.constant 0 : index
    %42 = vector.load %arg22[%c0_34, %c0_35] : memref<8x32xf32, #tpu.memory_space<vmem>>, vector<8x32xf32>
    tpu.vector_store %arg22[%c0_34, %c0_35], %41 {strides = array<i32>} : memref<8x32xf32, #tpu.memory_space<vmem>>, vector<8x32xf32>,
    %c0_36 = arith.constant 0 : index
    %c0_37 = arith.constant 0 : index
    %43 = vector.load %arg14[%c0_36, %c0_37] : memref<32x64xf32, #tpu.memory_space<vmem>>, vector<32x64xf32>
    %cst_38 = arith.constant dense<0.000000e+00> : vector<8x64xf32>
    %44 = tpu.matmul %35, %43, %cst_38 {dimension_numbers = #tpu.dot_dimension_numbers<[1], [0], [0], [1], [0, 0, 1, 1], [], []>} : vector<8x32xf32>, vector<32x64xf32>, vector<8x64xf32> -> vector<8x64xf32>
    %c0_39 = arith.constant 0 : index
    %c0_40 = arith.constant 0 : index
    %45 = vector.load %arg15[%c0_39, %c0_40] : memref<1x64xf32, #tpu.memory_space<vmem>>, vector<1x64xf32>
    %46 = vector.broadcast %45 : vector<1x64xf32> to vector<8x64xf32>
    %47 = arith.addf %44, %46 : vector<8x64xf32>
    %cst_41 = arith.constant 0.000000e+00 : f32
    %48 = vector.broadcast %cst_41 : f32 to vector<8x64xf32>
    %49 = arith.maximumf %47, %48 : vector<8x64xf32>
    %c0_42 = arith.constant 0 : index
    %c0_43 = arith.constant 0 : index
    %50 = vector.load %arg16[%c0_42, %c0_43] : memref<64x128xf32, #tpu.memory_space<vmem>>, vector<64x128xf32>
    %cst_44 = arith.constant dense<0.000000e+00> : vector<8x128xf32>
    %51 = tpu.matmul %49, %50, %cst_44 {dimension_numbers = #tpu.dot_dimension_numbers<[1], [0], [0], [1], [0, 0, 1, 1], [], []>} : vector<8x64xf32>, vector<64x128xf32>, vector<8x128xf32> -> vector<8x128xf32>
    %c0_45 = arith.constant 0 : index
    %c0_46 = arith.constant 0 : index
    %52 = vector.load %arg17[%c0_45, %c0_46] : memref<1x128xf32, #tpu.memory_space<vmem>>, vector<1x128xf32>
    %53 = vector.broadcast %52 : vector<1x128xf32> to vector<8x128xf32>
    %54 = arith.addf %51, %53 : vector<8x128xf32>
    %cst_47 = arith.constant 0.000000e+00 : f32
    %55 = vector.broadcast %cst_47 : f32 to vector<8x128xf32>
    %56 = arith.maximumf %54, %55 : vector<8x128xf32>
    %c0_48 = arith.constant 0 : index
    %c0_49 = arith.constant 0 : index
    %57 = vector.load %arg20[%c0_48, %c0_49] : memref<1x128xf32, #tpu.memory_space<vmem>>, vector<1x128xf32>
    %58 = vector.broadcast %57 : vector<1x128xf32> to vector<8x128xf32>
    %59 = arith.mulf %56, %58 : vector<8x128xf32>
    %c0_50 = arith.constant 0 : index
    %c0_51 = arith.constant 0 : index
    %60 = vector.load %arg21[%c0_50, %c0_51] : memref<1x128xf32, #tpu.memory_space<vmem>>, vector<1x128xf32>
    %61 = vector.broadcast %60 : vector<1x128xf32> to vector<8x128xf32>
    %62 = arith.addf %59, %61 : vector<8x128xf32>
    %c0_52 = arith.constant 0 : index
    %c0_53 = arith.constant 0 : index
    %63 = vector.load %arg1[%c0_52, %c0_53] : memref<8x128xf32, #tpu.memory_space<vmem>>, vector<8x128xf32>
    %c0_54 = arith.constant 0 : index
    %c0_55 = arith.constant 0 : index
    %64 = vector.load %arg2[%c0_54, %c0_55] : memref<1x128xf32, #tpu.memory_space<vmem>>, vector<1x128xf32>
    %65 = vector.broadcast %64 : vector<1x128xf32> to vector<8x128xf32>
    %66 = arith.mulf %63, %65 : vector<8x128xf32>
    %c0_56 = arith.constant 0 : index
    %c0_57 = arith.constant 0 : index
    %67 = vector.load %arg3[%c0_56, %c0_57] : memref<1x128xf32, #tpu.memory_space<vmem>>, vector<1x128xf32>
    %68 = vector.broadcast %67 : vector<1x128xf32> to vector<8x128xf32>
    %69 = arith.addf %66, %68 : vector<8x128xf32>
    %70 = arith.subf %69, %62 : vector<8x128xf32>
    %71 = arith.mulf %70, %70 : vector<8x128xf32>
    %cst_58 = arith.constant dense<0.000000e+00> : vector<8xf32>
    %72 = vector.multi_reduction <add>, %71, %cst_58 [1] : vector<8x128xf32> to vector<8xf32>
    %73 = vector.shape_cast %72 : vector<8xf32> to vector<8x1xf32>
    %c0_59 = arith.constant 0 : index
    %c0_60 = arith.constant 0 : index
    %74 = vector.load %arg23[%c0_59, %c0_60] : memref<8x1xf32, #tpu.memory_space<vmem>>, vector<8x1xf32>
    tpu.vector_store %arg23[%c0_59, %c0_60], %73 {strides = array<i32>} : memref<8x1xf32, #tpu.memory_space<vmem>>, vector<8x1xf32>,
    return
  }
  func.func @transform_0(%arg0: i32) -> (i32, i32) {
    %c0_i32 = arith.constant 0 : i32
    %c0_i32_0 = arith.constant 0 : i32
    return %arg0, %c0_i32 : i32, i32
  }
  func.func @transform_1(%arg0: i32) -> (i32, i32) {
    %c0_i32 = arith.constant 0 : i32
    %c0_i32_0 = arith.constant 0 : i32
    %c0_i32_1 = arith.constant 0 : i32
    return %c0_i32, %c0_i32_0 : i32, i32
  }
  func.func @transform_2(%arg0: i32) -> (i32, i32) {
    %c0_i32 = arith.constant 0 : i32
    %c0_i32_0 = arith.constant 0 : i32
    %c0_i32_1 = arith.constant 0 : i32
    return %c0_i32, %c0_i32_0 : i32, i32
  }
  func.func @transform_3(%arg0: i32) -> (i32, i32) {
    %c0_i32 = arith.constant 0 : i32
    %c0_i32_0 = arith.constant 0 : i32
    %c0_i32_1 = arith.constant 0 : i32
    return %c0_i32, %c0_i32_0 : i32, i32
  }
  func.func @transform_4(%arg0: i32) -> (i32, i32) {
    %c0_i32 = arith.constant 0 : i32
    %c0_i32_0 = arith.constant 0 : i32
    %c0_i32_1 = arith.constant 0 : i32
    return %c0_i32, %c0_i32_0 : i32, i32
  }
  func.func @transform_5(%arg0: i32) -> (i32, i32) {
    %c0_i32 = arith.constant 0 : i32
    %c0_i32_0 = arith.constant 0 : i32
    %c0_i32_1 = arith.constant 0 : i32
    return %c0_i32, %c0_i32_0 : i32, i32
  }
  func.func @transform_6(%arg0: i32) -> (i32, i32) {
    %c0_i32 = arith.constant 0 : i32
    %c0_i32_0 = arith.constant 0 : i32
    %c0_i32_1 = arith.constant 0 : i32
    return %c0_i32, %c0_i32_0 : i32, i32
  }
  func.func @transform_7(%arg0: i32) -> (i32, i32) {
    %c0_i32 = arith.constant 0 : i32
    %c0_i32_0 = arith.constant 0 : i32
    %c0_i32_1 = arith.constant 0 : i32
    return %c0_i32, %c0_i32_0 : i32, i32
  }
  func.func @transform_8(%arg0: i32) -> (i32, i32) {
    %c0_i32 = arith.constant 0 : i32
    %c0_i32_0 = arith.constant 0 : i32
    %c0_i32_1 = arith.constant 0 : i32
    return %c0_i32, %c0_i32_0 : i32, i32
  }
  func.func @transform_9(%arg0: i32) -> (i32, i32) {
    %c0_i32 = arith.constant 0 : i32
    %c0_i32_0 = arith.constant 0 : i32
    %c0_i32_1 = arith.constant 0 : i32
    return %c0_i32, %c0_i32_0 : i32, i32
  }
  func.func @transform_10(%arg0: i32) -> (i32, i32) {
    %c0_i32 = arith.constant 0 : i32
    %c0_i32_0 = arith.constant 0 : i32
    %c0_i32_1 = arith.constant 0 : i32
    return %c0_i32, %c0_i32_0 : i32, i32
  }
  func.func @transform_11(%arg0: i32) -> (i32, i32) {
    %c0_i32 = arith.constant 0 : i32
    %c0_i32_0 = arith.constant 0 : i32
    %c0_i32_1 = arith.constant 0 : i32
    return %c0_i32, %c0_i32_0 : i32, i32
  }
  func.func @transform_12(%arg0: i32) -> (i32, i32) {
    %c0_i32 = arith.constant 0 : i32
    %c0_i32_0 = arith.constant 0 : i32
    %c0_i32_1 = arith.constant 0 : i32
    return %c0_i32, %c0_i32_0 : i32, i32
  }
  func.func @transform_13(%arg0: i32) -> (i32, i32) {
    %c0_i32 = arith.constant 0 : i32
    %c0_i32_0 = arith.constant 0 : i32
    %c0_i32_1 = arith.constant 0 : i32
    return %c0_i32, %c0_i32_0 : i32, i32
  }
  func.func @transform_14(%arg0: i32) -> (i32, i32) {
    %c0_i32 = arith.constant 0 : i32
    %c0_i32_0 = arith.constant 0 : i32
    %c0_i32_1 = arith.constant 0 : i32
    return %c0_i32, %c0_i32_0 : i32, i32
  }
  func.func @transform_15(%arg0: i32) -> (i32, i32) {
    %c0_i32 = arith.constant 0 : i32
    %c0_i32_0 = arith.constant 0 : i32
    %c0_i32_1 = arith.constant 0 : i32
    return %c0_i32, %c0_i32_0 : i32, i32
  }
  func.func @transform_16(%arg0: i32) -> (i32, i32) {
    %c0_i32 = arith.constant 0 : i32
    %c0_i32_0 = arith.constant 0 : i32
    %c0_i32_1 = arith.constant 0 : i32
    return %c0_i32, %c0_i32_0 : i32, i32
  }
  func.func @transform_17(%arg0: i32) -> (i32, i32) {
    %c0_i32 = arith.constant 0 : i32
    %c0_i32_0 = arith.constant 0 : i32
    %c0_i32_1 = arith.constant 0 : i32
    return %c0_i32, %c0_i32_0 : i32, i32
  }
  func.func @transform_18(%arg0: i32) -> (i32, i32) {
    %c0_i32 = arith.constant 0 : i32
    %c0_i32_0 = arith.constant 0 : i32
    %c0_i32_1 = arith.constant 0 : i32
    return %c0_i32, %c0_i32_0 : i32, i32
  }
  func.func @transform_19(%arg0: i32) -> (i32, i32) {
    %c0_i32 = arith.constant 0 : i32
    %c0_i32_0 = arith.constant 0 : i32
    %c0_i32_1 = arith.constant 0 : i32
    return %c0_i32, %c0_i32_0 : i32, i32
  }
  func.func @transform_20(%arg0: i32) -> (i32, i32) {
    %c0_i32 = arith.constant 0 : i32
    %c0_i32_0 = arith.constant 0 : i32
    %c0_i32_1 = arith.constant 0 : i32
    return %c0_i32, %c0_i32_0 : i32, i32
  }
  func.func @transform_21(%arg0: i32) -> (i32, i32) {
    %c0_i32 = arith.constant 0 : i32
    %c0_i32_0 = arith.constant 0 : i32
    return %arg0, %c0_i32 : i32, i32
  }
  func.func @transform_22(%arg0: i32) -> (i32, i32) {
    %c0_i32 = arith.constant 0 : i32
    %c0_i32_0 = arith.constant 0 : i32
    return %arg0, %c0_i32 : i32, i32
  }
}

</mosaic_0001>

<bundles_post_ra>
// kernel: tpu_custom_call.1
= control target key start
LH: loop header
LB: loop body
LE: loop exit
PB: predicated region body
PF: predicated region fallthrough
CT: control target
= control target key end

     0   :  { %s903_s0 = inlined_call_operand.hbm [shape: f32[8,128], index: 0, kind: input, shape index: {}]   ;;  %s904_s1 = inlined_call_operand.vmem [shape: f32[1,128], index: 1, kind: input, shape index: {}]   ;;  %s905_s2 = inlined_call_operand.vmem [shape: f32[1,128], index: 2, kind: input, shape index: {}]   ;;  %s906_s3 = inlined_call_operand.vmem [shape: f32[128,128], index: 3, kind: input, shape index: {}]   ;;  %s907_s4 = inlined_call_operand.vmem [shape: f32[1,128], index: 4, kind: input, shape index: {}]   ;;  %s908_s5 = inlined_call_operand.hbm [shape: f32[128,128], index: 5, kind: input, shape index: {}]   ;;  %s909_s6 = inlined_call_operand.vmem [shape: f32[1,128], index: 6, kind: input, shape index: {}]   ;;  %s910_s7 = inlined_call_operand.vmem [shape: f32[128,64], index: 7, kind: input, shape index: {}]   ;;  %s911_s8 = inlined_call_operand.vmem [shape: f32[1,64], index: 8, kind: input, shape index: {}]   ;;  %s912_s9 = inlined_call_operand.vmem [shape: f32[64,32], index: 9, kind: input, shape index: {}]   ;;  %s913_s10 = inlined_call_operand.vmem [shape: f32[1,32], index: 10, kind: input, shape index: {}]   ;;  %s914_s11 = inlined_call_operand.vmem [shape: f32[32,32], index: 11, kind: input, shape index: {}]   ;;  %s915_s12 = inlined_call_operand.vmem [shape: f32[1,32], index: 12, kind: input, shape index: {}]   ;;  %s916_s13 = inlined_call_operand.hbm [shape: f32[32,64], index: 13, kind: input, shape index: {}]   ;;  %s917_s14 = inlined_call_operand.vmem [shape: f32[1,64], index: 14, kind: input, shape index: {}]   ;;  %s918_s15 = inlined_call_operand.vmem [shape: f32[64,128], index: 15, kind: input, shape index: {}]   ;;  %s919_s16 = inlined_call_operand.vmem [shape: f32[1,128], index: 16, kind: input, shape index: {}]   ;;  %s920_s17 = inlined_call_operand.vmem [shape: f32[1,32], index: 17, kind: input, shape index: {}]   ;;  %s921_s18 = inlined_call_operand.vmem [shape: f32[1,32], index: 18, kind: input, shape index: {}]   ;;  %s922_s19 = inlined_call_operand.vmem [shape: f32[1,128], index: 19, kind: input, shape index: {}]   ;;  %s923_s20 = inlined_call_operand.vmem [shape: f32[1,128], index: 20, kind: input, shape index: {}]   ;;  %s924_s21 = inlined_call_operand.hbm [shape: f32[8,32], index: 21, kind: output, shape index: {0}]   ;;  %s925_s22 = inlined_call_operand.vmem [shape: f32[8,1], index: 22, kind: output, shape index: {1}]  }
   0x1   :  { %927 = sst [smem:[#allocation12_spill]] %s903_s0 }
   0x2   :  { %928 = sst [smem:[#allocation13_spill]] %s904_s1 }
   0x3   :  { %929 = sst [smem:[#allocation14_spill]] %s905_s2 }
   0x4   :  { %930 = sst [smem:[#allocation15_spill]] %s906_s3 }
   0x5   :  { %931 = sst [smem:[#allocation16_spill]] %s907_s4 }
   0x6   :  { %932 = sst [smem:[#allocation17_spill]] %s908_s5 }
   0x7   :  { %933 = sst [smem:[#allocation18_spill]] %s909_s6 }
   0x8   :  { %934 = sst [smem:[#allocation19_spill]] %s925_s22 }
   0x9   :  { %28 = vsyncpa [#allocation3], 0 }
   0xa   :  { %29 = vsyncpa [#allocation6], 0  ;;  %s935_s29 = sld [smem:[#allocation17_spill]] }
  0x10   :  { %s54_s30 = sshll.u32 %s935_s29, 4  ;;  %s55_s30 = int_to_ptr.hbm [resolvable:$true] %s54_s30 }
  0x11   :  { %30 = vsyncpa [#allocation4], 0  ;;  %s563_s4 = smov [#allocation5]   ;;  %s936_s5 = sld [smem:[#allocation12_spill]] }
  0x12   :  { %s56_s0 = sshll.u32 %s563_s4, 4  ;;  %s564_s6 = smov 128   ;;  %s57_s0 = int_to_ptr.vmem [resolvable:$true] %s56_s0 }
  0x13   :  { %s565_s25 = smov 8   ;;  %s566_s26 = smov [#allocation2]  }
  0x14   :  { %62 = dma.hbm_to_vmem [thread:$0]  %s55_s30, 2048, %s57_s0, [#allocation6], %s564_s6, %s564_s6, %s565_s25  }
  0x15   :  { %s38_s2 = sshll.u32 %s566_s26, 4  ;;  %s81_s3 = sshll.u32 %s916_s13, 4  ;;  %s39_s2 = int_to_ptr.vmem [resolvable:$true] %s38_s2  ;;  %s82_s3 = int_to_ptr.hbm [resolvable:$true] %s81_s3 }
  0x16   :  { %s567_s28 = smov [#allocation7]  }
  0x17   :  { %s36_s24 = sshll.u32 %s936_s5, 4  ;;  %s83_s29 = sshll.u32 %s567_s28, 4  ;;  %s37_s24 = int_to_ptr.hbm [resolvable:$true] %s36_s24  ;;  %s84_s29 = int_to_ptr.vmem [resolvable:$true] %s83_s29 }
  0x18   :  { %41 = dma.hbm_to_vmem [thread:$0]  %s37_s24, 128, %s39_s2, [#allocation3]  }
  0x19   :  { %89 = dma.hbm_to_vmem [thread:$0]  %s82_s3, 512, %s84_s29, [#allocation6], %s564_s6, %s564_s6, %s565_s25  }
  0x1a   :  { %557 = dma.done.wait [#allocation3], 128  }
  0x1b   :  { %558 = vsyncadd [#allocation3], 4294967168 }
  0x1c   :  { %559 = dma.done.wait [#allocation6], 2560  }
  0x1d   :  { %560 = vsyncadd [#allocation6], 4294964736  ;;  %s937_s0 = sld [smem:[#allocation15_spill]]  ;;  %v173_v4 = vld [vmem:[#allocation5 + $0x78] sm:$0xff]  ;;  %v172_v6 = vld [vmem:[#allocation5 + $0x70] sm:$0xff]  ;;  %vm252_vm0 = vcmask 523264  }
  0x1e   :  { %178 = vmatpush.msra.mxu1 %v173_v4  ;;  %v171_v7 = vld [vmem:[#allocation5 + $0x68] sm:$0xff]  ;;  %v170_v10 = vld [vmem:[#allocation5 + $0x60] sm:$0xff]  ;;  %v169_v12 = vld [vmem:[#allocation5 + $0x58] sm:$0xff]  ;;  %s938_s26 = sld [smem:[#allocation16_spill]]  ;;  %vm285_vm1 = vcmask 261120   ;;  %s423_s29 = sshll.u32 %s924_s21, 4  ;;  %s424_s29 = int_to_ptr.hbm [resolvable:$true] %s423_s29 }
  0x1f   :  { %v168_v13 = vld [vmem:[#allocation5 + $0x50] sm:$0xff]  ;;  %v167_v15 = vld [vmem:[#allocation5 + $0x48] sm:$0xff]  ;;  %v166_v17 = vld [vmem:[#allocation5 + $0x40] sm:$0xff]  ;;  %s939_s2 = sld [smem:[#allocation18_spill]]  ;;  %vm414_vm2 = vcmask 7168  }
  0x20   :  { %179 = vmatpush.msra.mxu1 %v172_v6  ;;  %v165_v19 = vld [vmem:[#allocation5 + $0x38] sm:$0xff]  ;;  %v164_v21 = vld [vmem:[#allocation5 + $0x30] sm:$0xff]  ;;  %v163_v23 = vld [vmem:[#allocation5 + $0x28] sm:$0xff]  ;;  %s940_s27 = sld [smem:[#allocation13_spill]] }
  0x21   :  { %v162_v25 = vld [vmem:[#allocation5 + $0x20] sm:$0xff]  ;;  %v161_v27 = vld [vmem:[#allocation5 + $0x18] sm:$0xff]  ;;  %v160_v30 = vld [vmem:[#allocation5 + $0x10] sm:$0xff]  ;;  %s941_s23 = sld [smem:[#allocation14_spill]] }
  0x22   :  { %180 = vmatpush.msra.mxu1 %v171_v7  ;;  %v741_v29 = vld [vmem:[#allocation2] sm:$0xff]  ;;  %v159_v31 = vld [vmem:[#allocation5 + $0x8] sm:$0xff]  ;;  %v158_v32 = vld [vmem:[#allocation5] sm:$0xff]  ;;  %s942_s13 = sld [smem:[#allocation19_spill]] }
  0x23   :  { %v132_v0 = vld [vmem:[%s937_s0 + $0x78] sm:$0xff]  ;;  %v131_v1 = vld [vmem:[%s937_s0 + $0x70] sm:$0xff]  ;;  %v130_v2 = vld [vmem:[%s937_s0 + $0x68] sm:$0xff] }
  0x24   :  { %137 = vmatpush.msra.mxu0 %v132_v0  ;;  %v129_v3 = vld [vmem:[%s937_s0 + $0x60] sm:$0xff]  ;;  %v128_v5 = vld [vmem:[%s937_s0 + $0x58] sm:$0xff]  ;;  %v127_v8 = vld [vmem:[%s937_s0 + $0x50] sm:$0xff]  ;;  %181 = vmatpush.msra.mxu1 %v170_v10 }
  0x25   :  { %v126_v9 = vld [vmem:[%s937_s0 + $0x48] sm:$0xff]  ;;  %v125_v11 = vld [vmem:[%s937_s0 + $0x40] sm:$0xff]  ;;  %v124_v14 = vld [vmem:[%s937_s0 + $0x38] sm:$0xff] }
  0x26   :  { %138 = vmatpush.msra.mxu0 %v131_v1  ;;  %182 = vmatpush.msra.mxu1 %v169_v12  ;;  %v123_v16 = vld [vmem:[%s937_s0 + $0x30] sm:$0xff]  ;;  %v122_v18 = vld [vmem:[%s937_s0 + $0x28] sm:$0xff]  ;;  %v121_v20 = vld [vmem:[%s937_s0 + $0x20] sm:$0xff] }
  0x27   :  { %v120_v22 = vld [vmem:[%s937_s0 + $0x18] sm:$0xff]  ;;  %v119_v24 = vld [vmem:[%s937_s0 + $0x10] sm:$0xff]  ;;  %v118_v26 = vld [vmem:[%s937_s0 + $0x8] sm:$0xff] }
  0x28   :  { %139 = vmatpush.msra.mxu0 %v130_v2  ;;  %183 = vmatpush.msra.mxu1 %v168_v13  ;;  %v117_v28 = vld [vmem:[%s937_s0] sm:$0xff]  ;;  %v214_v33 = vld [vmem:[%s910_s7 + $0x78] sm:$0xff]  ;;  %v213_v34 = vld [vmem:[%s910_s7 + $0x70] sm:$0xff] }
  0x29   :  { %219 = vmatpush.msra.mxu2 %v214_v33  ;;  %v212_v35 = vld [vmem:[%s910_s7 + $0x68] sm:$0xff]  ;;  %v211_v36 = vld [vmem:[%s910_s7 + $0x60] sm:$0xff]  ;;  %v210_v37 = vld [vmem:[%s910_s7 + $0x58] sm:$0xff] }
  0x2a   :  { %140 = vmatpush.msra.mxu0 %v129_v3  ;;  %184 = vmatpush.msra.mxu1 %v167_v15  ;;  %v209_v38 = vld [vmem:[%s910_s7 + $0x50] sm:$0xff]  ;;  %v208_v39 = vld [vmem:[%s910_s7 + $0x48] sm:$0xff]  ;;  %v207_v40 = vld [vmem:[%s910_s7 + $0x40] sm:$0xff] }
  0x2b   :  { %220 = vmatpush.msra.mxu2 %v213_v34  ;;  %v206_v41 = vld [vmem:[%s910_s7 + $0x38] sm:$0xff]  ;;  %v205_v42 = vld [vmem:[%s910_s7 + $0x30] sm:$0xff]  ;;  %v204_v43 = vld [vmem:[%s910_s7 + $0x28] sm:$0xff] }
  0x2c   :  { %141 = vmatpush.msra.mxu0 %v128_v5  ;;  %185 = vmatpush.msra.mxu1 %v166_v17  ;;  %v203_v44 = vld [vmem:[%s910_s7 + $0x20] sm:$0xff]  ;;  %v202_v45 = vld [vmem:[%s910_s7 + $0x18] sm:$0xff]  ;;  %v201_v50 = vld [vmem:[%s910_s7 + $0x10] sm:$0xff] }
  0x2d   :  { %221 = vmatpush.msra.mxu2 %v212_v35  ;;  %v448_v46 = vld [vmem:[%s938_s26] ss:$0 sm:$0xff]  ;;  %v200_v51 = vld [vmem:[%s910_s7 + $0x8] sm:$0xff]  ;;  %v247_v53 = vld [vmem:[%s912_s9 + $0x38] sm:$0xff] }
  0x2e   :  { %142 = vmatpush.msra.mxu0 %v127_v8  ;;  %186 = vmatpush.msra.mxu1 %v165_v19  ;;  %v199_v52 = vld [vmem:[%s910_s7] sm:$0xff]  ;;  %v246_v54 = vld [vmem:[%s912_s9 + $0x30] sm:$0xff]  ;;  %v245_v55 = vld [vmem:[%s912_s9 + $0x28] sm:$0xff] }
  0x2f   :  { %222 = vmatpush.msra.mxu2 %v211_v36  ;;  %264 = vmatpush.msra.mxu3 %v247_v53  ;;  %v244_v56 = vld [vmem:[%s912_s9 + $0x20] sm:$0xff]  ;;  %v243_v57 = vld [vmem:[%s912_s9 + $0x18] sm:$0xff]  ;;  %v242_v62 = vld [vmem:[%s912_s9 + $0x10] sm:$0xff] }
  0x30   :  { %143 = vmatpush.msra.mxu0 %v126_v9  ;;  %187 = vmatpush.msra.mxu1 %v164_v21  ;;  %v449_v58 = vld [vmem:[%s939_s2] ss:$0 sm:$0xff]  ;;  %v241_v63 = vld [vmem:[%s912_s9 + $0x8] sm:$0xff]  ;;  %v280_v1 = vld [vmem:[%s914_s11 + $0x18] sm:$0xff] }
  0x31   :  { %223 = vmatpush.msra.mxu2 %v210_v37  ;;  %265 = vmatpush.msra.mxu3 %v246_v54  ;;  %v240_v0 = vld [vmem:[%s912_s9] sm:$0xff]  ;;  %v279_v2 = vld [vmem:[%s914_s11 + $0x10] sm:$0xff]  ;;  %v278_v7 = vld [vmem:[%s914_s11 + $0x8] sm:$0xff] }
  0x32   :  { %144 = vmatpush.msra.mxu0 %v125_v11  ;;  %188 = vmatpush.msra.mxu1 %v163_v23  ;;  %v450_v3 = vld [vmem:[%s911_s8] ss:$0 sm:$0xff]  ;;  %v323_v10 = vld [vmem:[#allocation7 + $0x10] sm:$0xff]  ;;  %v322_v15 = vld [vmem:[#allocation7 + $0x8] sm:$0xff] }
  0x33   :  { %224 = vmatpush.msra.mxu2 %v209_v38  ;;  %266 = vmatpush.msra.mxu3 %v245_v55  ;;  %v277_v8 = vld [vmem:[%s914_s11] sm:$0xff]  ;;  %v360_v17 = vld [vmem:[%s918_s15 + $0x38] sm:$0xff]  ;;  %v358_v19 = vld [vmem:[%s918_s15 + $0x28] sm:$0xff] }
  0x34   :  { %145 = vmatpush.msra.mxu0 %v124_v14  ;;  %189 = vmatpush.msra.mxu1 %v162_v25  ;;  %v324_v9 = vld [vmem:[#allocation7 + $0x18] sm:$0xff]  ;;  %v356_v21 = vld [vmem:[%s918_s15 + $0x18] sm:$0xff] }
  0x35   :  { %225 = vmatpush.msra.mxu2 %v208_v39  ;;  %267 = vmatpush.msra.mxu3 %v244_v56  ;;  %v451_v11 = vld [vmem:[%s913_s10] ss:$0 sm:$0xff]  ;;  %s568_s10 = smov [#allocation8]  }
  0x36   :  { %146 = vmatpush.msra.mxu0 %v123_v16  ;;  %190 = vmatpush.msra.mxu1 %v161_v27  ;;  %v321_v16 = vld [vmem:[#allocation7] sm:$0xff]  ;;  %v453_v25 = vld [vmem:[%s920_s17] ss:$0 sm:$0xff] }
  0x37   :  { %226 = vmatpush.msra.mxu2 %v207_v40  ;;  %268 = vmatpush.msra.mxu3 %v243_v57  ;;  %v454_v27 = vld [vmem:[%s921_s18] ss:$0 sm:$0xff] }
  0x38   :  { %147 = vmatpush.msra.mxu0 %v122_v18  ;;  %191 = vmatpush.msra.mxu1 %v160_v30  ;;  %v359_v18 = vld [vmem:[%s918_s15 + $0x30] sm:$0xff]  ;;  %v353_v33 = vld [vmem:[%s918_s15] sm:$0xff] }
  0x39   :  { %227 = vmatpush.msra.mxu2 %v206_v41  ;;  %269 = vmatpush.msra.mxu3 %v242_v62  ;;  %v455_v34 = vld [vmem:[%s917_s14] ss:$0 sm:$0xff] }
  0x3a   :  { %148 = vmatpush.msra.mxu0 %v121_v20  ;;  %192 = vmatpush.msra.mxu1 %v159_v31  ;;  %v357_v20 = vld [vmem:[%s918_s15 + $0x20] sm:$0xff]  ;;  %v355_v31 = vld [vmem:[%s918_s15 + $0x10] sm:$0xff] }
  0x3b   :  { %228 = vmatpush.msra.mxu2 %v205_v42  ;;  %270 = vmatpush.msra.mxu3 %v241_v63  ;;  %v456_v38 = vld [vmem:[%s919_s16] ss:$0 sm:$0xff] }
  0x3c   :  { %149 = vmatpush.msra.mxu0 %v120_v22  ;;  %193 = vmatpush.msra.mxu1 %v158_v32  ;;  %v452_v22 = vld [vmem:[%s915_s12] ss:$0 sm:$0xff]  ;;  %v354_v32 = vld [vmem:[%s918_s15 + $0x8] sm:$0xff]  ;;  %s421_s15 = sshll.u32 %s568_s10, 4  ;;  %s422_s15 = int_to_ptr.vmem [resolvable:$true] %s421_s15 }
  0x3d   :  { %229 = vmatpush.msra.mxu2 %v204_v43  ;;  %271 = vmatpush.msra.mxu3 %v240_v0  ;;  %v459_v39 = vld [vmem:[%s940_s27] ss:$0 sm:$0xff] }
  0x3e   :  { %150 = vmatpush.msra.mxu0 %v119_v24  ;;  %v457_v42 = vld [vmem:[%s922_s19] ss:$0 sm:$0xff]  ;;  %v404_v43 = vmul.f32 %v459_v39, %v741_v29 }
  0x3f   :  { %230 = vmatpush.msra.mxu2 %v203_v44  ;;  %301 = vmatpush.msrb.mxu3 %v280_v1  ;;  %v460_v44 = vld [vmem:[%s941_s23] ss:$0 sm:$0xff] }
  0x40   :  { %151 = vmatpush.msra.mxu0 %v118_v26 }
  0x41   :  { %231 = vmatpush.msra.mxu2 %v202_v45  ;;  %302 = vmatpush.msrb.mxu3 %v279_v2 }
  0x42   :  { %152 = vmatpush.msra.mxu0 %v117_v28 }
  0x43   :  { %153 = vmatmul.f32.vlgmr.msra.gmra.mxu0 %v741_v29  ;;  %232 = vmatpush.msra.mxu2 %v201_v50 }
  0x44   :  { %303 = vmatpush.msrb.mxu3 %v278_v7  ;;  %376 = vmatpush.msrb.mxu0 %v360_v17 }
  0x45   :  { %233 = vmatpush.msra.mxu2 %v200_v51 }
  0x46   :  { %304 = vmatpush.msrb.mxu3 %v277_v8  ;;  %377 = vmatpush.msrb.mxu0 %v359_v18 }
  0x47   :  { %234 = vmatpush.msra.mxu2 %v199_v52 }
  0x48   :  { %378 = vmatpush.msrb.mxu0 %v358_v19 }
  0x4a   :  { %379 = vmatpush.msrb.mxu0 %v357_v20 }
  0x4c   :  { %380 = vmatpush.msrb.mxu0 %v356_v21 }
  0x4e   :  { %381 = vmatpush.msrb.mxu0 %v355_v31 }
  0x50   :  { %382 = vmatpush.msrb.mxu0 %v354_v32 }
  0x52   :  { %383 = vmatpush.msrb.mxu0 %v353_v33 }
  0xc0   :  { %v154_v47 = vpop.f32.mrf.mxu0 }
  0xc1   :  { %v155_v48 = vadd.f32 %v448_v46, %v154_v47  ;;  %v458_v46 = vld [vmem:[%s923_s20] ss:$0 sm:$0xff] }
  0xc3   :  { %v157_v49 = vmax.f32 %v155_v48, 0.0  ;;  %v409_v48 = vadd.f32 %v460_v44, %v404_v43 }
  0xc5   :  { %194 = vmatmul.f32.vlgmr.msra.gmra.mxu1 %v157_v49 }
 0x142   :  { %v195_v59 = vpop.f32.mrf.mxu1 }
 0x143   :  { %v196_v60 = vadd.f32 %v449_v58, %v195_v59 }
 0x145   :  { %v198_v61 = vmax.f32 %v196_v60, 0.0 }
 0x147   :  { %235 = vmatmul.f32.vlgmr.msra.gmra.mxu2 %v198_v61 }
 0x1ca   :  { %v236_v4 = vpop.f32.mrf.mxu2 }
 0x1cb   :  { %v237_v5 = vadd.f32 %v450_v3, %v236_v4 }
 0x1cd   :  { %v239_v6 = vmax.f32 %v237_v5, 0.0 }
 0x1cf   :  { %438 = vmatmul.msk.f32.vlgmr.msra.gmra.mxu3 %vm252_vm0, %v239_v6 }
 0x1d0   :  { %344 = vmatpush.msra.mxu3 %v324_v9 }
 0x1d2   :  { %345 = vmatpush.msra.mxu3 %v323_v10 }
 0x1d4   :  { %346 = vmatpush.msra.mxu3 %v322_v15 }
 0x1d6   :  { %347 = vmatpush.msra.mxu3 %v321_v16 }
 0x252   :  { %v273_v12 = vpop.f32.mrf.mxu3 }
 0x253   :  { %v274_v13 = vadd.f32 %v451_v11, %v273_v12 }
 0x255   :  { %v276_v14 = vmax.f32 %v274_v13, 0.0 }
 0x257   :  { %439 = vmatmul.msk.f32.vlgmr.msrb.gmra.mxu3 %vm285_vm1, %v276_v14 }
 0x2da   :  { %v306_v23 = vpop.f32.mrf.mxu3 }
 0x2db   :  { %v307_v24 = vadd.f32 %v452_v22, %v306_v23 }
 0x2dd   :  { %v309_v26 = vmax.f32 %v307_v24, 0.0 }
 0x2df   :  { %v314_v28 = vmul.f32 %v453_v25, %v309_v26  ;;  %440 = vmatmul.msk.f32.vlgmr.msra.gmra.mxu3 %vm285_vm1, %v309_v26 }
 0x2e1   :  { %v319_v30 = vadd.f32 %v454_v27, %v314_v28 }
 0x2e3   :  { %320 = vst.msk [vmem:[#allocation8] sm:$0xff] %vm285_vm1, %v319_v30 }
 0x2e4   :  { %426 = dma.vmem_to_hbm [thread:$0]  %s422_s15, 128, %s424_s29, [#allocation4]  }
 0x362   :  { %v349_v35 = vpop.f32.mrf.mxu3 }
 0x363   :  { %v350_v36 = vadd.f32 %v455_v34, %v349_v35 }
 0x365   :  { %v352_v37 = vmax.f32 %v350_v36, 0.0 }
 0x367   :  { %441 = vmatmul.msk.f32.vlgmr.msrb.gmra.mxu0 %vm252_vm0, %v352_v37 }
 0x3e4   :  { %v385_v40 = vpop.f32.mrf.mxu0 }
 0x3e5   :  { %v386_v41 = vadd.f32 %v456_v38, %v385_v40 }
 0x3e7   :  { %v388_v45 = vmax.f32 %v386_v41, 0.0 }
 0x3e9   :  { %v393_v47 = vmul.f32 %v457_v42, %v388_v45 }
 0x3eb   :  { %v398_v49 = vadd.f32 %v458_v46, %v393_v47 }
 0x3ed   :  { %v410_v50 = vsub.f32 %v409_v48, %v398_v49 }
 0x3ef   :  { %v411_v51 = vmul.f32 %v410_v50, %v410_v50 }
 0x3f1   :  { %412 = vadd.xlane.f32.xlu0 %v411_v51 }
 0x464   :  { %v413_v52 = vpop.xlane.xlu0 %412 }
 0x465   :  { %415 = vst.msk [vmem:[%s942_s13] sm:$0xff] %vm414_vm2, %v413_v52 }
 0x466   :  { %561 = dma.done.wait [#allocation4], 128  }
 0x467   :  { %562 = vsyncadd [#allocation4], 4294967168 }
 0x468   :  { %435 = vsyncpa [#allocation3], 1 }
 0x469   :  { %436 = vsyncpa [#allocation6], 1 }
 0x46a   :  { %437 = vsyncpa [#allocation4], 1 }

</bundles_post_ra>
